<compile_context>
chip_gen: v6e
topology: v6e:2x2x1
jax: 0.10.0
libtpu: 0.0.40
codegen_flags: <defaults>
</compile_context>

<pallas_src>
import functools
import math

import jax
import jax.numpy as jnp
from jax import lax
from jax.experimental import pallas as pl
from jax.experimental.pallas import tpu as pltpu


def _round_up(x, m):
    return ((x + m - 1) // m) * m


_BN_EPS = 1e-5


def _vmem_cap_bytes():
    # Per-generation VMEM cap (v7x has 64 MiB/TC; v5e/v6e 128 MiB).
    try:
        return int(0.70 * pltpu.get_tpu_info().vmem_capacity_bytes)
    except Exception:
        return 44 << 20          # safe for every generation


# --------------------------------------------------------------------------
# Pallas kernels
# --------------------------------------------------------------------------

def _fused_gemm_kernel(a_ref, scale_ref, shift_ref, b_ref, bias_ref, o_ref,
                       acc_ref, *, apply_act):
    """out = (relu(a*scale+shift) if apply_act else a) @ b + bias.

    a/b are bf16, prologue math is f32 (cast to bf16 right before the MXU),
    accumulation is f32; scale/shift are selected per-N-block (per branch)."""
    k = pl.program_id(2)

    @pl.when(k == 0)
    def _():
        acc_ref[...] = jnp.zeros_like(acc_ref)

    a = a_ref[...]
    if apply_act:
        a = jnp.maximum(a.astype(jnp.float32) * scale_ref[0] + shift_ref[0],
                        0.0).astype(b_ref.dtype)
    acc_ref[...] += jnp.dot(a, b_ref[...], preferred_element_type=jnp.float32)

    @pl.when(k == pl.num_programs(2) - 1)
    def _():
        o_ref[...] = (acc_ref[...] + bias_ref[...]).astype(o_ref.dtype)


@functools.lru_cache(maxsize=None)
def _build_gemm(Mp, Kp, Np, tm, tk, tn, apply_act, out_dtype_name):
    out_dtype = jnp.dtype(out_dtype_name)
    kernel = functools.partial(_fused_gemm_kernel, apply_act=apply_act)
    # per-block VMEM footprint (double-buffered ins/outs + f32 accumulator)
    in_bytes = 2 * (tm * tk * 2 + 2 * tk * 4 + tk * tn * 2 + tn * 4)
    out_bytes = 2 * tm * tn * out_dtype.itemsize
    acc_bytes = tm * tn * 4
    vmem_limit = int(min(_vmem_cap_bytes(),
                         max(in_bytes + out_bytes + acc_bytes + (4 << 20),
                             16 << 20)))
    return pl.pallas_call(
        kernel,
        out_shape=jax.ShapeDtypeStruct((Mp, Np), out_dtype),
        grid_spec=pltpu.PrefetchScalarGridSpec(
            num_scalar_prefetch=0,
            grid=(Mp // tm, Np // tn, Kp // tk),
            in_specs=[
                pl.BlockSpec((tm, tk), lambda i, j, k: (i, k)),
                pl.BlockSpec((1, 1, tk), lambda i, j, k: (j, 0, k)),
                pl.BlockSpec((1, 1, tk), lambda i, j, k: (j, 0, k)),
                pl.BlockSpec((tk, tn), lambda i, j, k: (k, j)),
                pl.BlockSpec((1, tn), lambda i, j, k: (0, j)),
            ],
            out_specs=pl.BlockSpec((tm, tn), lambda i, j, k: (i, j)),
            scratch_shapes=[pltpu.VMEM((tm, tn), jnp.float32)],
        ),
        compiler_params=pltpu.CompilerParams(
            dimension_semantics=("parallel", "parallel", "arbitrary"),
            vmem_limit_bytes=vmem_limit,
        ),
    )


def gemm_grouped(a, group_weights, group_biases, group_scales=None,
                 group_shifts=None, out_dtype=jnp.bfloat16):
    """One Pallas GEMM for several column groups sharing the same A matrix.

    a: [M, K] (cast to bf16).  Group g computes
        relu(a * scale_g + shift_g) @ W_g + b_g     (scale/shift optional).
    Returns a list of [M, N_g] outputs (one per group)."""
    M, K = a.shape
    apply_act = group_scales is not None
    G = len(group_weights)
    widths = [int(w.shape[1]) for w in group_weights]

    # ---- tile selection ----
    Mp16 = _round_up(M, 16)                      # bf16 sublane packing
    tm = Mp16 if Mp16 <= 256 else 256
    Mp = _round_up(M, tm)
    Kp128 = _round_up(K, 128)
    if Kp128 <= 1024:
        tk, Kp = Kp128, Kp128
    else:
        nks = -(-Kp128 // 1024)
        tk = _round_up(-(-Kp128 // nks), 128)
        Kp = _round_up(K, tk)
    if G > 1:
        tn = 128                                 # per-group padding stays tight
    else:
        Np0 = _round_up(widths[0], 128)
        tn = 256 if (Np0 % 256 == 0 and Np0 >= 256) else 128
    padded_w = [_round_up(w, tn) for w in widths]
    Np = sum(padded_w)
    nb = Np // tn

    # ---- operand assembly (XLA glue, all bf16 / tiny f32) ----
    a_p = jnp.pad(a.astype(jnp.bfloat16), ((0, Mp - M), (0, Kp - K)))
    b_p = jnp.concatenate(
        [jnp.pad(w.astype(jnp.bfloat16), ((0, Kp - K), (0, pw - nw)))
         for w, nw, pw in zip(group_weights, widths, padded_w)], axis=1)
    bias_p = jnp.concatenate(
        [jnp.pad(b.reshape(1, -1).astype(jnp.float32), ((0, 0), (0, pw - nw)))
         for b, nw, pw in zip(group_biases, widths, padded_w)], axis=1)
    if apply_act:
        sc_rows, sh_rows = [], []
        for g in range(G):
            sc = jnp.pad(group_scales[g].astype(jnp.float32), (0, Kp - K))
            sh = jnp.pad(group_shifts[g].astype(jnp.float32), (0, Kp - K))
            reps = padded_w[g] // tn
            sc_rows += [sc] * reps
            sh_rows += [sh] * reps
        scale_p = jnp.stack(sc_rows)[:, None, :]         # (nb, 1, Kp)
        shift_p = jnp.stack(sh_rows)[:, None, :]
    else:
        scale_p = jnp.ones((nb, 1, Kp), jnp.float32)
        shift_p = jnp.zeros((nb, 1, Kp), jnp.float32)

    out = _build_gemm(Mp, Kp, Np, tm, tk, tn, apply_act,
                      jnp.dtype(out_dtype).name)(a_p, scale_p, shift_p,
                                                 b_p, bias_p)

    outs, off = [], 0
    for nw, pw in zip(widths, padded_w):
        outs.append(out[:M, off:off + nw])
        off += pw
    return outs


def _maxpool3x3_kernel(x_ref, o_ref, pad_ref, *, stride):
    """3x3 max pool (padding=1) on one image block, fully vectorized taps.

    Borders are handled with a -inf halo built in a VMEM scratch (no HBM pad);
    stride-2 column subsampling is done in-kernel with a 0/1 selection matmul
    so only the strided output is written back."""
    H, W = x_ref.shape[1], x_ref.shape[2]
    Ho, Wo = o_ref.shape[1], o_ref.shape[2]

    pad_ref[...] = jnp.full(pad_ref.shape, -jnp.inf, pad_ref.dtype)
    pad_ref[1:H + 1, 1:W + 1, :] = x_ref[0]

    H1 = stride * (Ho - 1) + 1
    W1 = stride * (Wo - 1) + 1
    m = pad_ref[0:H1, 0:W1, :]
    for dh in range(3):
        for dw in range(3):
            if dh == 0 and dw == 0:
                continue
            m = jnp.maximum(m, pad_ref[dh:dh + H1, dw:dw + W1, :])

    if stride == 1:
        o_ref[0] = m                                   # single block store
    else:
        # column subsample via a tiny (Wo x W1) 0/1 selection matmul
        rows = lax.broadcasted_iota(jnp.int32, (Wo, W1), 0)
        cols = lax.broadcasted_iota(jnp.int32, (Wo, W1), 1)
        sel = (cols == rows * stride).astype(m.dtype)
        for ho in range(Ho):
            row = m[ho * stride]                       # (W1, C)
            o_ref[0, ho] = jnp.dot(
                sel, row, preferred_element_type=jnp.float32
            ).astype(o_ref.dtype)


@functools.lru_cache(maxsize=None)
def _build_maxpool(N, H, W, C, Ho, Wo, stride, dtype_name):
    dtype = jnp.dtype(dtype_name)
    kernel = functools.partial(_maxpool3x3_kernel, stride=stride)
    return pl.pallas_call(
        kernel,
        out_shape=jax.ShapeDtypeStruct((N, Ho, Wo, C), dtype),
        grid_spec=pltpu.PrefetchScalarGridSpec(
            num_scalar_prefetch=0,
            grid=(N,),
            in_specs=[pl.BlockSpec((1, H, W, C), lambda n: (n, 0, 0, 0))],
            out_specs=pl.BlockSpec((1, Ho, Wo, C), lambda n: (n, 0, 0, 0)),
            scratch_shapes=[pltpu.VMEM((H + 2, W + 2, C), dtype)],
        ),
        compiler_params=pltpu.CompilerParams(
            dimension_semantics=("parallel",)),
    )


def maxpool3x3_pallas(x, stride):
    """3x3 max pool, padding=1, floor output size (PyTorch default). NHWC."""
    N, H, W, C = x.shape
    Ho = (H + 2 - 3) // stride + 1
    Wo = (W + 2 - 3) // stride + 1
    return _build_maxpool(N, H, W, C, Ho, Wo, stride,
                          jnp.dtype(x.dtype).name)(x)


def _gap_kernel(x_ref, o_ref):
    hw = x_ref.shape[1]
    o_ref[...] = jnp.sum(x_ref[...].astype(jnp.float32), axis=1) * (1.0 / hw)


def global_avg_pool_pallas(x):
    """x: [N, H, W, C] -> [N, C] (mean over H, W), f32 output."""
    N, H, W, C = x.shape
    x3 = x.reshape(N, H * W, C)
    return pl.pallas_call(
        _gap_kernel,
        out_shape=jax.ShapeDtypeStruct((N, C), jnp.float32),
    )(x3)


# --------------------------------------------------------------------------
# JAX glue: im2col, module composition
# --------------------------------------------------------------------------

def _im2col(xp, k, stride):
    """xp: already-padded [N,Hp,Wp,C] -> patches [N*Ho*Wo, k*k*C] (dh,dw,c)."""
    N, Hp, Wp, C = xp.shape
    Ho = (Hp - k) // stride + 1
    Wo = (Wp - k) // stride + 1
    cols = []
    for dh in range(k):
        for dw in range(k):
            sl = lax.slice(xp, (0, dh, dw, 0),
                           (N, dh + (Ho - 1) * stride + 1,
                            dw + (Wo - 1) * stride + 1, C),
                           (1, stride, stride, 1))
            cols.append(sl)
    patches = jnp.concatenate(cols, axis=-1)
    return patches.reshape(N * Ho * Wo, k * k * C), (N, Ho, Wo)


def _bn_affine(p):
    scale = p["gamma"] / jnp.sqrt(p["var"] + _BN_EPS)
    shift = p["beta"] - p["mean"] * scale
    return scale, shift


def basic_conv2d(x, p):
    """BasicConv2d: BN(inference) -> ReLU -> Conv, fused into one Pallas GEMM."""
    N, H, W, C = x.shape
    k, s, pad = p["k"], p["stride"], p["pad"]
    scale, shift = _bn_affine(p)

    if pad > 0:
        # Conv zero-pads the *post* BN+ReLU activation.  Pad the raw input with
        # a per-channel value v s.t. relu(v*scale + shift) == 0 (robust to bf16
        # rounding) so BN+ReLU stays fused inside the GEMM prologue and exact.
        safe = jnp.where(scale == 0.0, 1.0, scale)
        padv = jnp.where(scale == 0.0, 0.0,
                         -(1.0 + jnp.abs(shift) + shift) / safe)
        # TODO(synk): degenerate case scale==0 (gamma==0) with shift>0 is not
        #             reproduced exactly (would require explicit patch masking).
        Hp, Wp = H + 2 * pad, W + 2 * pad
        xp = jnp.broadcast_to(padv.astype(x.dtype).reshape(1, 1, 1, C),
                              (N, Hp, Wp, C))
        xp = lax.dynamic_update_slice(xp, x, (0, pad, pad, 0))
    else:
        xp = x

    if k == 1 and s == 1:
        patches, (n, ho, wo) = xp.reshape(N * H * W, C), (N, H, W)
    else:
        # TODO(synk): k>1 convs still materialize the im2col patch matrix in
        #             HBM (now in bf16); folding the (dh,dw) taps into the GEMM
        #             K axis would remove the remaining k*k bandwidth cost.
        patches, (n, ho, wo) = _im2col(xp, k, s)

    w2 = p["w"].reshape(k * k * C, -1)
    sc = jnp.tile(scale, k * k)
    sh = jnp.tile(shift, k * k)
    (out,) = gemm_grouped(patches, [w2], [p["b"]], [sc], [sh],
                          out_dtype=jnp.bfloat16)
    return out.reshape(n, ho, wo, -1)


def inception(x, p):
    N, H, W, C = x.shape
    a = x.reshape(N * H * W, C)

    # Fuse the three 1x1 convs that share the raw input into ONE wide GEMM;
    # per-branch BN scale/shift is selected per-N-block inside the kernel.
    ws, bs, scs, shs = [], [], [], []
    for name in ("b1", "b2a", "b3a"):
        q = p[name]
        sc, sh = _bn_affine(q)
        ws.append(q["w"].reshape(C, -1))
        bs.append(q["b"])
        scs.append(sc)
        shs.append(sh)
    o1, o2a, o3a = gemm_grouped(a, ws, bs, scs, shs, out_dtype=jnp.bfloat16)

    x1 = o1.reshape(N, H, W, -1)
    x2 = basic_conv2d(o2a.reshape(N, H, W, -1), p["b2b"])
    x3 = basic_conv2d(o3a.reshape(N, H, W, -1), p["b3b"])
    x4 = basic_conv2d(maxpool3x3_pallas(x, 1), p["b4"])
    return jnp.concatenate([x1, x2, x3, x4], axis=-1)


def googlenet_forward(x_nchw, params):
    """x_nchw: [N, 3, H, W] (PyTorch layout) -> scores (torch.squeeze semantics)."""
    x = jnp.transpose(x_nchw, (0, 2, 3, 1)).astype(jnp.bfloat16)   # NCHW -> NHWC
    # stage 1
    x = basic_conv2d(x, params["s1_conv1"])
    x = maxpool3x3_pallas(x, 2)
    x = basic_conv2d(x, params["s1_conv2"])
    x = basic_conv2d(x, params["s1_conv3"])
    x = maxpool3x3_pallas(x, 2)
    x = inception(x, params["s1_inc1"])
    x = inception(x, params["s1_inc2"])
    x = maxpool3x3_pallas(x, 2)
    x = inception(x, params["s1_inc3"])
    # stage 2
    x = inception(x, params["s2_inc1"])
    x = inception(x, params["s2_inc2"])
    x = inception(x, params["s2_inc3"])
    # stage 3
    x = inception(x, params["s3_inc1"])
    x = maxpool3x3_pallas(x, 2)
    x = inception(x, params["s3_inc2"])
    x = inception(x, params["s3_inc3"])
    pooled = global_avg_pool_pallas(x)                      # [N, 1024] f32
    # classify: 1x1 conv == matmul over channels (no BN/ReLU prologue here)
    (scores,) = gemm_grouped(pooled.astype(jnp.bfloat16),
                             [params["classify_w"]], [params["classify_b"]],
                             out_dtype=jnp.float32)         # [N, num_classes]
    scores = scores[:, :, None, None]                       # [N, nc, 1, 1]
    return jnp.squeeze(scores)                              # torch.squeeze


# --------------------------------------------------------------------------
# Deterministic parameter construction
# --------------------------------------------------------------------------

def _conv_params(key, cin, cout, k, stride, pad):
    kw, kb = jax.random.split(key)
    fan_in = cin * k * k
    w = jax.random.normal(kw, (k, k, cin, cout), jnp.float32) * math.sqrt(2.0 / fan_in)
    b = jax.random.normal(kb, (cout,), jnp.float32) * 0.01
    return dict(
        w=w, b=b,
        gamma=jnp.ones((cin,), jnp.float32),
        beta=jnp.zeros((cin,), jnp.float32),
        mean=jnp.zeros((cin,), jnp.float32),
        var=jnp.ones((cin,), jnp.float32),
        k=k, stride=stride, pad=pad,
    )


def _inception_params(key, cin, oc):
    k1, k2a, k2b, k3a, k3b, k4 = jax.random.split(key, 6)
    return dict(
        b1=_conv_params(k1, cin, oc[0][0], 1, 1, 0),
        b2a=_conv_params(k2a, cin, oc[1][0], 1, 1, 0),
        b2b=_conv_params(k2b, oc[1][0], oc[1][1], 3, 1, 1),
        b3a=_conv_params(k3a, cin, oc[2][0], 1, 1, 0),
        b3b=_conv_params(k3b, oc[2][0], oc[2][1], 5, 1, 2),
        b4=_conv_params(k4, cin, oc[3][0], 1, 1, 0),
    )


def build_params(key, num_classes):
    ks = list(jax.random.split(key, 17))
    p = {}
    p["s1_conv1"] = _conv_params(ks[0], 3, 64, 7, 2, 3)
    p["s1_conv2"] = _conv_params(ks[1], 64, 64, 1, 1, 0)
    p["s1_conv3"] = _conv_params(ks[2], 64, 192, 3, 1, 1)
    p["s1_inc1"] = _inception_params(ks[3], 192, [[64], [96, 128], [16, 32], [32]])
    p["s1_inc2"] = _inception_params(ks[4], 256, [[128], [128, 192], [32, 96], [64]])
    p["s1_inc3"] = _inception_params(ks[5], 480, [[192], [96, 208], [16, 48], [64]])
    p["s2_inc1"] = _inception_params(ks[6], 512, [[160], [112, 224], [24, 64], [64]])
    p["s2_inc2"] = _inception_params(ks[7], 512, [[128], [128, 256], [24, 64], [64]])
    p["s2_inc3"] = _inception_params(ks[8], 512, [[112], [144, 288], [32, 64], [64]])
    p["s3_inc1"] = _inception_params(ks[9], 528, [[256], [160, 320], [32, 128], [128]])
    p["s3_inc2"] = _inception_params(ks[10], 832, [[256], [160, 320], [32, 128], [128]])
    p["s3_inc3"] = _inception_params(ks[11], 832, [[384], [192, 384], [48, 128], [128]])
    p["classify_w"] = jax.random.normal(ks[12], (1024, num_classes),
                                        jnp.float32) * math.sqrt(1.0 / 1024.0)
    p["classify_b"] = jax.random.normal(ks[13], (num_classes,), jnp.float32) * 0.01
    return p


# --------------------------------------------------------------------------

if __name__ == "__main__":
    num_classes = 10
    key = jax.random.PRNGKey(0)
    pkey, xkey = jax.random.split(key)

    params = build_params(pkey, num_classes)
    x = jax.random.normal(xkey, (2, 3, 64, 64), jnp.float32)   # NCHW like PyTorch

    scores = googlenet_forward(x, params)
    scores = jax.block_until_ready(scores)

    assert scores.shape == (2, num_classes), scores.shape
    assert bool(jnp.all(jnp.isfinite(scores)))
    print("KERNEL_OK")
</pallas_src>

<mosaic_0001>
module attributes {stable_mosaic.version = 11 : i64} {
  func.func @_fused_gemm_kernel(%arg0: i32, %arg1: i32, %arg2: i32, %arg3: memref<256x256xbf16, #tpu.memory_space<vmem>>, %arg4: memref<1x1x256xf32, #tpu.memory_space<vmem>>, %arg5: memref<1x1x256xf32, #tpu.memory_space<vmem>>, %arg6: memref<256x128xbf16, #tpu.memory_space<vmem>>, %arg7: memref<1x128xf32, #tpu.memory_space<vmem>>, %arg8: memref<256x128xbf16, #tpu.memory_space<vmem>>, %arg9: memref<256x128xf32, #tpu.memory_space<vmem>>) attributes {dimension_semantics = [#tpu.dimension_semantics<parallel>, #tpu.dimension_semantics<parallel>, #tpu.dimension_semantics<arbitrary>], iteration_bounds = array<i64: 8, 1, 1>, scalar_prefetch = 0 : i64, scratch_operands = 1 : i64, tpu.core_type = #tpu.core_type<tc>, window_params = [{transform_indices = @transform_0, window_bounds = array<i64: 256, 256>}, {transform_indices = @transform_1, window_bounds = array<i64: 1, 1, 256>}, {transform_indices = @transform_2, window_bounds = array<i64: 1, 1, 256>}, {transform_indices = @transform_3, window_bounds = array<i64: 256, 128>}, {transform_indices = @transform_4, window_bounds = array<i64: 1, 128>}, {transform_indices = @transform_5, window_bounds = array<i64: 256, 128>}]} {
    %c0_i32 = arith.constant 0 : i32
    %0 = arith.cmpi eq, %arg2, %c0_i32 : i32
    %1 = arith.extui %0 : i1 to i32
    %c0_i32_0 = arith.constant 0 : i32
    %2 = arith.cmpi ne, %1, %c0_i32_0 : i32
    scf.if %2 {
      %cst_17 = arith.constant 0.000000e+00 : f32
      %24 = vector.broadcast %cst_17 : f32 to vector<256x128xf32>
      %c0_18 = arith.constant 0 : index
      %c0_19 = arith.constant 0 : index
      %25 = vector.load %arg9[%c0_18, %c0_19] : memref<256x128xf32, #tpu.memory_space<vmem>>, vector<256x128xf32>
      tpu.vector_store %arg9[%c0_18, %c0_19], %24 {strides = array<i32>} : memref<256x128xf32, #tpu.memory_space<vmem>>, vector<256x128xf32>,
    } else {
    }
    %c0 = arith.constant 0 : index
    %c0_1 = arith.constant 0 : index
    %3 = vector.load %arg3[%c0, %c0_1] : memref<256x256xbf16, #tpu.memory_space<vmem>>, vector<256x256xbf16>
    %4 = arith.extf %3 : vector<256x256xbf16> to vector<256x256xf32>
    %c0_2 = arith.constant 0 : index
    %c0_3 = arith.constant 0 : index
    %c0_4 = arith.constant 0 : index
    %5 = vector.load %arg4[%c0_2, %c0_3, %c0_4] : memref<1x1x256xf32, #tpu.memory_space<vmem>>, vector<1x1x256xf32>
    %6 = vector.shape_cast %5 : vector<1x1x256xf32> to vector<1x256xf32>
    %7 = vector.broadcast %6 : vector<1x256xf32> to vector<256x256xf32>
    %8 = arith.mulf %4, %7 : vector<256x256xf32>
    %c0_5 = arith.constant 0 : index
    %c0_6 = arith.constant 0 : index
    %c0_7 = arith.constant 0 : index
    %9 = vector.load %arg5[%c0_5, %c0_6, %c0_7] : memref<1x1x256xf32, #tpu.memory_space<vmem>>, vector<1x1x256xf32>
    %10 = vector.shape_cast %9 : vector<1x1x256xf32> to vector<1x256xf32>
    %11 = vector.broadcast %10 : vector<1x256xf32> to vector<256x256xf32>
    %12 = arith.addf %8, %11 : vector<256x256xf32>
    %cst = arith.constant 0.000000e+00 : f32
    %13 = vector.broadcast %cst : f32 to vector<256x256xf32>
    %14 = arith.maximumf %12, %13 : vector<256x256xf32>
    %15 = arith.truncf %14 : vector<256x256xf32> to vector<256x256xbf16>
    %c0_8 = arith.constant 0 : index
    %c0_9 = arith.constant 0 : index
    %16 = vector.load %arg9[%c0_8, %c0_9] : memref<256x128xf32, #tpu.memory_space<vmem>>, vector<256x128xf32>
    %c0_10 = arith.constant 0 : index
    %c0_11 = arith.constant 0 : index
    %17 = vector.load %arg6[%c0_10, %c0_11] : memref<256x128xbf16, #tpu.memory_space<vmem>>, vector<256x128xbf16>
    %cst_12 = arith.constant dense<0.000000e+00> : vector<256x128xf32>
    %18 = tpu.matmul %15, %17, %cst_12 {dimension_numbers = #tpu.dot_dimension_numbers<[1], [0], [0], [1], [0, 0, 1, 1], [], []>} : vector<256x256xbf16>, vector<256x128xbf16>, vector<256x128xf32> -> vector<256x128xf32>
    %19 = arith.addf %16, %18 : vector<256x128xf32>
    %c0_13 = arith.constant 0 : index
    %c0_14 = arith.constant 0 : index
    %20 = vector.load %arg9[%c0_13, %c0_14] : memref<256x128xf32, #tpu.memory_space<vmem>>, vector<256x128xf32>
    tpu.vector_store %arg9[%c0_13, %c0_14], %19 {strides = array<i32>} : memref<256x128xf32, #tpu.memory_space<vmem>>, vector<256x128xf32>,
    %c0_i32_15 = arith.constant 0 : i32
    %21 = arith.cmpi eq, %arg2, %c0_i32_15 : i32
    %22 = arith.extui %21 : i1 to i32
    %c0_i32_16 = arith.constant 0 : i32
    %23 = arith.cmpi ne, %22, %c0_i32_16 : i32
    scf.if %23 {
      %c0_17 = arith.constant 0 : index
      %c0_18 = arith.constant 0 : index
      %24 = vector.load %arg9[%c0_17, %c0_18] : memref<256x128xf32, #tpu.memory_space<vmem>>, vector<256x128xf32>
      %c0_19 = arith.constant 0 : index
      %c0_20 = arith.constant 0 : index
      %25 = vector.load %arg7[%c0_19, %c0_20] : memref<1x128xf32, #tpu.memory_space<vmem>>, vector<1x128xf32>
      %26 = vector.broadcast %25 : vector<1x128xf32> to vector<256x128xf32>
      %27 = arith.addf %24, %26 : vector<256x128xf32>
      %28 = arith.truncf %27 : vector<256x128xf32> to vector<256x128xbf16>
      %c0_21 = arith.constant 0 : index
      %c0_22 = arith.constant 0 : index
      %29 = vector.load %arg8[%c0_21, %c0_22] : memref<256x128xbf16, #tpu.memory_space<vmem>>, vector<256x128xbf16>
      tpu.vector_store %arg8[%c0_21, %c0_22], %28 {strides = array<i32>} : memref<256x128xbf16, #tpu.memory_space<vmem>>, vector<256x128xbf16>,
    } else {
    }
    return
  }
  func.func @transform_0(%arg0: i32, %arg1: i32, %arg2: i32) -> (i32, i32) {
    %c0_i32 = arith.constant 0 : i32
    return %arg0, %arg2 : i32, i32
  }
  func.func @transform_1(%arg0: i32, %arg1: i32, %arg2: i32) -> (i32, i32, i32) {
    %c0_i32 = arith.constant 0 : i32
    %c0_i32_0 = arith.constant 0 : i32
    return %arg1, %c0_i32, %arg2 : i32, i32, i32
  }
  func.func @transform_2(%arg0: i32, %arg1: i32, %arg2: i32) -> (i32, i32, i32) {
    %c0_i32 = arith.constant 0 : i32
    %c0_i32_0 = arith.constant 0 : i32
    return %arg1, %c0_i32, %arg2 : i32, i32, i32
  }
  func.func @transform_3(%arg0: i32, %arg1: i32, %arg2: i32) -> (i32, i32) {
    %c0_i32 = arith.constant 0 : i32
    return %arg2, %arg1 : i32, i32
  }
  func.func @transform_4(%arg0: i32, %arg1: i32, %arg2: i32) -> (i32, i32) {
    %c0_i32 = arith.constant 0 : i32
    %c0_i32_0 = arith.constant 0 : i32
    return %c0_i32, %arg1 : i32, i32
  }
  func.func @transform_5(%arg0: i32, %arg1: i32, %arg2: i32) -> (i32, i32) {
    %c0_i32 = arith.constant 0 : i32
    return %arg0, %arg1 : i32, i32
  }
}

</mosaic_0001>

<bundles_post_ra>
// kernel: tpu_custom_call.1
= control target key start
LH: loop header
LB: loop body
LE: loop exit
PB: predicated region body
PF: predicated region fallthrough
CT: control target
= control target key end

     0   :  { %s2599_s0 = inlined_call_operand.hbm [shape: bf16[2048,256], index: 0, kind: input, shape index: {}]   ;;  %s2600_s1 = inlined_call_operand.hbm [shape: f32[1,1,256], index: 1, kind: input, shape index: {}]   ;;  %s2601_s2 = inlined_call_operand.vmem [shape: f32[1,1,256], index: 2, kind: input, shape index: {}]   ;;  %s2602_s3 = inlined_call_operand.hbm [shape: bf16[256,128], index: 3, kind: input, shape index: {}]   ;;  %s2603_s4 = inlined_call_operand.vmem [shape: f32[1,128], index: 4, kind: input, shape index: {}]   ;;  %s2604_s5 = inlined_call_operand.hbm [shape: bf16[2048,128], index: 5, kind: output, shape index: {}]  }
   0x1   :  { %2613 = sst [smem:[#allocation15_spill]] %s2600_s1 }
   0x2   :  { %10 = vsyncpa [#allocation4], 0 }
   0x3   :  { %12 = vsyncpa [#allocation4 + $0x1], 0 }
   0x4   :  { %13 = vsyncpa [#allocation7], 0 }
   0x5   :  { %14 = vsyncpa [#allocation5], 0 }
   0x6   :  { %16 = vsyncpa [#allocation5 + $0x1], 0  ;;  %s2173_s18 = smov 0   ;;  %s2175_s19 = smov 0  }
   0x7   :  { %s2177_s20 = smov 0   ;;  %s2179_s21 = smov 0  }
   0x8   :  { %s2181_s22 = smov 0   ;;  %s2183_s23 = smov 0  }
   0x9 LB: > { %2614 = sst [smem:[#allocation13_spill]] %s2111_s18  ;;  %s1533_s24 = sadd.s32 4294967295, %s2131_s23   ;;  %s2131_s23 = sphi %s2183_s23, %s22_s23   ;;  %s2127_s22 = sphi %s2181_s22, %s2639_s22   ;;  %s2123_s21 = sphi %s2179_s21, %s2638_s21   ;;  %s2119_s20 = sphi %s2177_s20, %s2637_s20   ;;  %s2115_s19 = sphi %s2175_s19, %s2636_s19   ;;  %s2111_s18 = sphi %s2173_s18, %s2635_s18  }
   0xa   : > { %s1534_s25 = sadd.s32 4294967294, %s2131_s23   ;;  %p57_p0 = scmp.ne.s32.totalorder %s2119_s20, %s2115_s19 }
   0xb   : > { %p58_p1 = scmp.eq.s32.totalorder %s2131_s23, 0  ;;  %p63_p2 = scmp.ne.s32.totalorder %s2115_s19, %s2111_s18 }
   0xc   : > { %p2211_p3 = scmp.eq.s32.totalorder %s1533_s24, 0  ;;  %p199_p4 = scmp.eq.s32.totalorder %s1533_s24, 7 }
   0xd   : > { %p2215_p5 = por %p58_p1, %p57_p0  ;;  %p205_p6 = scmp.eq.s32.totalorder %s1534_s25, 7 }
   0xe   : > { %s2615_s27 = scalar_select %p2211_p3, 1, 0 }
   0xf   : > { %p2221_p7 = por %p2211_p3, %p63_p2  ;;  %p2225_p8 = por %p199_p4, %p57_p0 }
  0x10   : > { %p2229_p9 = por %p205_p6, %p63_p2  ;;  %p1535_p10 = scmp.ge.s32.totalorder %s2131_s23, 1 }
  0x11   : > { %s2617_s29 = scalar_select %p2221_p7, 1, 0 }
  0x12   : > { %s2618_s30 = scalar_select %p2225_p8, 1, 0 }
  0x13   : > { %s2619_s6 = scalar_select %p2229_p9, 1, 0 }
  0x14   : > { %p212_p11 = scmp.lt.s32.totalorder %s2131_s23, 9  ;;  %s2133_s8 = smov [#allocation6]  }
  0x15   : > { %2620 = sst [smem:[#allocation14_spill]] %s2619_s6  ;;  %s230_s9 = sshll.u32 %s2133_s8, 4  ;;  %s231_s9 = int_to_ptr.vmem [resolvable:$true] %s230_s9 }
  0x16   : > { %p2235_p12 = pnand %p1535_p10, %p212_p11  ;;  %p1891_p13 = scmp.lt.s32.totalorder %s2131_s23, 8 }
  0x17   : > { %s2134_s11 = smov [#allocation8]   ;;  %s1978_s14 = scalar_lea.vmem %s231_s9, 32 }
  0x18   : > { %s2621_s7 = scalar_select %p2235_p12, 1, 0 }
  0x19   : > { %p1874_p0 = pneg %p2235_p12  ;;  %p2244_p1 = pnand %p1891_p13, %p2215_p5 }
  0x1a   : > { %s256_s12 = sshll.u32 %s2134_s11, 4  ;;  %p1979_p6 = scmp.ne.s32.totalorder %s231_s9, %s1978_s14  ;;  %s257_s12 = int_to_ptr.vmem [resolvable:$true] %s256_s12 }
  0x1b   : > { %s2622_s10 = scalar_select %p2244_p1, 1, 0 }
  0x1c   : > { %p2250_p2 = pnand %p1874_p0, %p2211_p3  ;;  %p1986_p11 = scmp.lt.s32.totalorder %s231_s9, %s231_s9 }
  0x1d   : > { %p1987_p13 = scmp.lt.s32.totalorder %s1978_s14, %s1978_s14 }
  0x1e   : > { %p1969_p4 = pneg %p2250_p2 }
  0x1f   : > { %p1988_p9 = por %p1987_p13, %p1986_p11 }
  0x20   : > { %p1981_p5 = pnand %p1979_p6, %p1969_p4 }
  0x22   : > { %p1982_p10 = pneg %p1981_p5 }
  0x24   : > { %p1989_p8 = pnand %p1988_p9, %p1982_p10 }
  0x26   : > { %1992 = shalt.err (!%p1989_p8)
}
  0x27   : > { %s2624_s1 = sld [smem:[#allocation15_spill]]  ;;  %s2004_s17 = scalar_lea.vmem %s257_s12, 2048 }
  0x28   : > { %p2005_p0 = scmp.ne.s32.totalorder %s257_s12, %s2004_s17  ;;  %p2012_p6 = scmp.lt.s32.totalorder %s257_s12, %s257_s12 }
  0x29   : > { %p2013_p5 = scmp.lt.s32.totalorder %s2004_s17, %s2004_s17 }
  0x2a   : > { %p2007_p3 = pnand %p2005_p0, %p1969_p4 }
  0x2b   : > { %p2014_p12 = por %p2013_p5, %p2012_p6 }
  0x2c   : > { %p2008_p7 = pneg %p2007_p3 }
  0x2d   : > { %1877 = dma.hbm_to_vmem [thread:$0]  (!%p2250_p2), %s2624_s1, 32, %s231_s9, [#allocation7]  }
  0x2e   : > { %p2015_p1 = pnand %p2014_p12, %p2008_p7 }
  0x30   : > { %2018 = shalt.err (!%p2015_p1)
}
  0x31   : > { %s2135_s24 = smov 64   ;;  %s2136_s25 = smov 4  }
  0x32   : > { %1880 = dma.hbm_to_vmem [thread:$0]  (!%p2250_p2), %s2602_s3, 2048, %s257_s12, [#allocation7], %s2135_s24, %s2135_s24, %s2136_s25  }
  0x33   : > { %s276_s9 = sand.u32 1, %s2119_s20   ;;  %s41_s11 = sadd.s32 1, %s2127_s22 }
  0x34   : > { %s1541_s14 = sshll.u32 %s276_s9, 8  ;;  %p43_p3 = scmp.ge.s32.totalorder %s41_s11, 8 }
  0x35   : > { %s1605_s15 = sshll.u32 %s2127_s22, 12  ;;  %s280_s16 = scalar_lea.vmem [#allocation3], %s1541_s14 }
  0x36   : > { %s290_s17 = sshll.u32 %s280_s16, 4  ;;  %s2641_s11 = smov (%p43_p3, %s41_s11), 0  ;;  %s291_s17 = int_to_ptr.vmem [resolvable:$true] %s290_s17 }
  0x37   : > { %s289_s6 = scalar_lea.hbm %s2599_s0, %s1605_s15  ;;  %s45_s13 = ssub.s32 %s2127_s22, %s2641_s11 }
  0x38   : > { %p2282_p7 = scmp.eq.s32.totalorder %s45_s13, 0  ;;  %s277_s12 = scalar_lea.sflag [#allocation4], %s276_s9 }
  0x39   : > { %p2626_p8 = scmp.ne.s32.totalorder %s2622_s10, 0  ;;  %s2032_s24 = scalar_lea.vmem %s291_s17, 4096 }
  0x3a   : > { %p2033_p12 = scmp.ne.s32.totalorder %s291_s17, %s2032_s24  ;;  %s2137_s25 = smov [#allocation3]  }
  0x3b   : > { %p2021_p9 = pneg %p2626_p8  ;;  %s2037_s28 = sshll.u32 %s2137_s25, 4  ;;  %s2038_s28 = int_to_ptr.vmem [resolvable:$false] %s2037_s28 }
  0x3c   : > { %s2039_s8 = scalar_lea.vmem %s2038_s28, 8192  ;;  %p2040_p4 = scmp.lt.s32.totalorder %s291_s17, %s2038_s28 }
  0x3d   : > { %p2035_p1 = pnand %p2033_p12, %p2021_p9  ;;  %p2041_p10 = scmp.lt.s32.totalorder %s2039_s8, %s2032_s24 }
  0x3f   : > { %p2036_p2 = pneg %p2035_p1  ;;  %p2042_p11 = por %p2041_p10, %p2040_p4 }
  0x41   : > { %p2043_p13 = pnand %p2042_p11, %p2036_p2 }
  0x43   : > { %2046 = shalt.err (!%p2043_p13)
}
  0x44   : > { %s2138_s1 = smov 128   ;;  %s2139_s26 = smov 8  }
  0x45   : > { %1884 = dma.hbm_to_vmem [thread:$0]  (!%p2626_p8), %s289_s6, 4096, %s291_s17, %s277_s12, %s2138_s1, %s2138_s1, %s2139_s26  }
  0x46   : > { %s2627_s9 = sadd.s32 1, %s2119_s20  ;;  %p2628_p0 = scmp.ne.s32.totalorder %s2621_s7, 0 }
  0x47   : > { %s2295_s14 = scalar_select %p2282_p7, %s2119_s20, %s2627_s9  }
  0x48   : > { %302 = sbr.rel (%p2628_p0) target bundleno = 389 (0x185), region = 40  ;;  %s2300_s15 = sand.u32 (!%p2628_p0), 1, %s2115_s19  }
  0x49   : > { %s1546_s16 = sshll.u32 (!%p2628_p0), %s2300_s15, 8  ;;  %s305_s13 = scalar_lea.sflag (!%p2628_p0), [#allocation4], %s2300_s15 }
  0x4a   : > { %s2304_s24 = scalar_lea.vmem (!%p2628_p0), [#allocation3], %s1546_s16  ;;  %p2629_p6 = scmp.ne.s32.totalorder (!%p2628_p0), %s2617_s29, 0 }
  0x4d   : > { %2098 = dma.done.wait (%p2629_p6), %s305_s13, 4096  }
  0x4e   : > { %2100 = vsyncadd (%p2629_p6), %s305_s13, 4294963200  ;;  %p2630_p5 = scmp.ne.s32.totalorder %s2615_s27, 0 }
  0x50   : > { %2102 = dma.done.wait (%p2630_p5), [#allocation7], 2080  }
  0x51   : > { %2104 = vsyncadd (%p2630_p5), [#allocation7], 4294965216  ;;  %v1951_v0 = vld [vmem:[#allocation8 + $0x78] sm:$0xff]   ;;  %v1953_v2 = vld [vmem:[#allocation8 + $0x70] sm:$0xff]   ;;  %v506_v5 = vlaneseq  ;;  %s1549_s7 = sshll.u32 %s2300_s15, 7  ;;  %s1638_s17 = sshll.u32 %s2123_s21, 11 }
  0x52   : > { %v1952_v1 = vld [vmem:[#allocation8 + $0x38] sm:$0xff]   ;;  %1734 = vmatprep.subr.bf16.mxu0 %v1951_v0  ;;  %1846 = vmatprep.subr.bf16.mxu1 %v1951_v0  ;;  %v1954_v3 = vld [vmem:[#allocation8 + $0x30] sm:$0xff]   ;;  %v1955_v4 = vld [vmem:[#allocation8 + $0x68] sm:$0xff]   ;;  %s2499_s10 = scalar_lea.vmem [#allocation9], %s1549_s7  ;;  %s2548_s8 = scalar_lea.hbm %s2604_s5, %s1638_s17 }
  0x53   : > { %1735 = vmatpush3.bf16.msra.mxu0 %v1952_v1  ;;  %1854 = vmatpush3.bf16.msra.mxu1 %v1952_v1  ;;  %v1956_v6 = vld [vmem:[#allocation8 + $0x28] sm:$0xff]   ;;  %v1957_v7 = vld [vmem:[#allocation8 + $0x60] sm:$0xff]   ;;  %v507_v8 = vshrl.u32 %v506_v5, 7  ;;  %v1959_v10 = vld [vmem:[#allocation8 + $0x58] sm:$0xff]   ;;  %s1386_s12 = sshll.u32 %s2499_s10, 4  ;;  %s1372_s21 = scalar_lea.sflag [#allocation5], %s2300_s15  ;;  %s2550_s12 = int_to_ptr.vmem [resolvable:$true] %s1386_s12 }
  0x54   : > { %1736 = vmatprep.subr.bf16.mxu0 %v1953_v2  ;;  %1847 = vmatprep.subr.bf16.mxu1 %v1953_v2  ;;  %v1958_v9 = vld [vmem:[#allocation8 + $0x20] sm:$0xff]   ;;  %v1960_v12 = vld [vmem:[#allocation8 + $0x18] sm:$0xff]   ;;  %v1961_v14 = vld [vmem:[#allocation8 + $0x50] sm:$0xff]   ;;  %s2047_s1 = scalar_lea.vmem %s2550_s12, 2048  ;;  %p2631_p7 = scmp.ne.s32.totalorder %s2618_s30, 0 }
  0x55   : > { %v508_v11 = vsub.s32 0, %v507_v8  ;;  %v512_v13 = vsub.s32 1, %v507_v8  ;;  %v408_v15 = vld [vmem:[%s2304_s24] sm:$0xff]  ;;  %v409_v16 = vld [vmem:[%s2304_s24 + $0x8] sm:$0xff]  ;;  %v2330_v29 = vld [vmem:[%s2304_s24 + $0x10] sm:$0xff]  ;;  %p2048_p3 = scmp.ne.s32.totalorder %s2550_s12, %s2047_s1  ;;  %s2140_s26 = smov [#allocation9]  }
  0x56   : > { %v504_v17 = vld [vmem:[#allocation6] sm:$0x3]  ;;  %v440_v18 = vunpack.c.l.bf16 %v408_v15  ;;  %v441_v19 = vunpack.c.h.bf16 %v408_v15  ;;  %v442_v20 = vunpack.c.l.bf16 %v409_v16  ;;  %v443_v21 = vunpack.c.h.bf16 %v409_v16  ;;  %v425_v24 = vld [vmem:[%s2304_s24 + $0x88] sm:$0xff]  ;;  %v1962_v30 = vld [vmem:[#allocation8 + $0x10] sm:$0xff]   ;;  %s2051_s9 = sshll.u32 %s2140_s26, 4  ;;  %s2052_s9 = int_to_ptr.vmem [resolvable:$false] %s2051_s9 }
  0x57   : > { %1737 = vmatpush3.bf16.msra.mxu0 %v1954_v3  ;;  %1855 = vmatpush3.bf16.msra.mxu1 %v1954_v3  ;;  %v580_v22 = vld [vmem:[%s2601_s2] sm:$0x3]  ;;  %v2321_v25 = vrot.slane %v504_v17, %v508_v11  ;;  %v2323_v26 = vrot.slane %v504_v17, %v512_v13  ;;  %v474_v33 = vunpack.c.l.bf16 %v425_v24  ;;  %v475_v34 = vunpack.c.h.bf16 %v425_v24  ;;  %v1963_v35 = vld [vmem:[#allocation8 + $0x48] sm:$0xff]   ;;  %v411_v39 = vld [vmem:[%s2304_s24 + $0x18] sm:$0xff]  ;;  %p2049_p8 = pnand %p2048_p3, %p2631_p7  ;;  %s2053_s16 = scalar_lea.vmem %s2052_s9, 4096 }
  0x58   : > { %1738 = vmatprep.subr.bf16.mxu0 %v1955_v4  ;;  %1848 = vmatprep.subr.bf16.mxu1 %v1955_v4  ;;  %v424_v23 = vld [vmem:[%s2304_s24 + $0x80] sm:$0xff]  ;;  %v2325_v27 = vrot.slane %v580_v22, %v508_v11  ;;  %v2327_v28 = vrot.slane %v580_v22, %v512_v13  ;;  %v445_v40 = vunpack.c.h.bf16 %v2330_v29  ;;  %v1964_v49 = vld [vmem:[#allocation8 + $0x8] sm:$0xff]   ;;  %v447_v53 = vunpack.c.h.bf16 %v411_v39  ;;  %v427_v0 = vld [vmem:[%s2304_s24 + $0x98] sm:$0xff]  ;;  %p2054_p12 = scmp.lt.s32.totalorder %s2550_s12, %s2052_s9  ;;  %p2055_p1 = scmp.lt.s32.totalorder %s2053_s16, %s2047_s1 }
  0x59   : > { %v472_v31 = vunpack.c.l.bf16 %v424_v23  ;;  %v473_v32 = vunpack.c.h.bf16 %v424_v23  ;;  %v517_v36 = vmul.f32 %v2323_v26, %v441_v19  ;;  %v519_v37 = vmul.f32 %v2323_v26, %v443_v21  ;;  %v1965_v54 = vld [vmem:[#allocation8 + $0x40] sm:$0xff]   ;;  %v426_v59 = vld [vmem:[%s2304_s24 + $0x90] sm:$0xff]  ;;  %p2050_p9 = pneg %p2049_p8 }
  0x5a   : > { %v516_v38 = vmul.f32 %v2321_v25, %v440_v18  ;;  %v551_v42 = vmul.f32 %v2323_v26, %v475_v34  ;;  %v518_v43 = vmul.f32 %v2321_v25, %v442_v20  ;;  %v550_v48 = vmul.f32 %v2321_v25, %v474_v33  ;;  %v1966_v5 = vld [vmem:[#allocation8] sm:$0xff]   ;;  %p2056_p2 = por %p2055_p1, %p2054_p12 }
  0x5b   : > { %1739 = vmatpush3.bf16.msra.mxu0 %v1956_v6  ;;  %1856 = vmatpush3.bf16.msra.mxu1 %v1956_v6  ;;  %v549_v41 = vmul.f32 %v2323_v26, %v473_v32  ;;  %v548_v44 = vmul.f32 %v2321_v25, %v472_v31  ;;  %v593_v45 = vadd.f32 %v2327_v28, %v517_v36  ;;  %v444_v13 = vunpack.c.l.bf16 %v2330_v29  ;;  %v412_v18 = vld [vmem:[%s2304_s24 + $0x20] sm:$0xff]  ;;  %v413_v31 = vld [vmem:[%s2304_s24 + $0x28] sm:$0xff] }
  0x5c   : > { %1740 = vmatprep.subr.bf16.mxu0 %v1957_v7  ;;  %1849 = vmatprep.subr.bf16.mxu1 %v1957_v7  ;;  %v595_v46 = vadd.f32 %v2327_v28, %v519_v37  ;;  %v592_v47 = vadd.f32 %v2325_v27, %v516_v38  ;;  %v627_v51 = vadd.f32 %v2327_v28, %v551_v42  ;;  %v446_v16 = vunpack.c.l.bf16 %v411_v39  ;;  %v428_v36 = vld [vmem:[%s2304_s24 + $0xa0] sm:$0xff]  ;;  %p2057_p4 = pnand %p2056_p2, %p2050_p9 }
  0x5d   : > { %v625_v50 = vadd.f32 %v2327_v28, %v549_v41  ;;  %v594_v52 = vadd.f32 %v2325_v27, %v518_v43  ;;  %v657_v55 = vmax.f32 %v593_v45, 0.0  ;;  %v624_v58 = vadd.f32 %v2325_v27, %v548_v44  ;;  %v429_v41 = vld [vmem:[%s2304_s24 + $0xa8] sm:$0xff] }
  0x5e   : > { %v659_v56 = vmax.f32 %v595_v46, 0.0  ;;  %v656_v57 = vmax.f32 %v592_v47, 0.0  ;;  %v691_v61 = vmax.f32 %v627_v51, 0.0  ;;  %v626_v63 = vadd.f32 %v2325_v27, %v550_v48 }
  0x5f   : > { %1741 = vmatpush3.bf16.msra.mxu0 %v1958_v9  ;;  %1857 = vmatpush3.bf16.msra.mxu1 %v1958_v9  ;;  %v689_v60 = vmax.f32 %v625_v50, 0.0  ;;  %v658_v62 = vmax.f32 %v594_v52, 0.0  ;;  %v688_v2 = vmax.f32 %v624_v58, 0.0  ;;  %v521_v3 = vmul.f32 %v2323_v26, %v445_v40 }
  0x60   : > { %1742 = vmatprep.subr.bf16.mxu0 %v1959_v10  ;;  %1850 = vmatprep.subr.bf16.mxu1 %v1959_v10  ;;  %v721_v1 = vpack.c.bf16 %v659_v56, %v657_v55  ;;  %v523_v4 = vmul.f32 %v2323_v26, %v447_v53  ;;  %v690_v8 = vmax.f32 %v626_v63, 0.0  ;;  %v477_v9 = vunpack.c.h.bf16 %v426_v59 }
  0x61   : > { %v737_v6 = vpack.c.bf16 %v691_v61, %v689_v60  ;;  %v720_v7 = vpack.c.bf16 %v658_v62, %v656_v57  ;;  %v597_v10 = vadd.f32 %v2327_v28, %v521_v3  ;;  %v476_v17 = vunpack.c.l.bf16 %v426_v59  ;;  %v414_v62 = vld [vmem:[%s2304_s24 + $0x30] sm:$0xff] }
  0x62   : > { %v599_v11 = vadd.f32 %v2327_v28, %v523_v4  ;;  %944 = vmatprep.mubr.bf16.mxu0 %v721_v1  ;;  %v553_v15 = vmul.f32 %v2323_v26, %v477_v9  ;;  %v520_v22 = vmul.f32 %v2321_v25, %v444_v13  ;;  %v522_v24 = vmul.f32 %v2321_v25, %v446_v16 }
  0x63   : > { %1743 = vmatpush3.bf16.msra.mxu0 %v1960_v12  ;;  %1858 = vmatpush3.bf16.msra.mxu1 %v1960_v12  ;;  %v479_v12 = vunpack.c.h.bf16 %v427_v0  ;;  %v661_v19 = vmax.f32 %v597_v10, 0.0  ;;  %v478_v29 = vunpack.c.l.bf16 %v427_v0  ;;  %v451_v44 = vunpack.c.h.bf16 %v413_v31 }
  0x64   : > { %1744 = vmatprep.subr.bf16.mxu0 %v1961_v14  ;;  %1851 = vmatprep.subr.bf16.mxu1 %v1961_v14  ;;  %v736_v14 = vpack.c.bf16 %v690_v8, %v688_v2  ;;  %v663_v20 = vmax.f32 %v599_v11, 0.0  ;;  %v629_v23 = vadd.f32 %v2327_v28, %v553_v15  ;;  %v596_v34 = vadd.f32 %v2325_v27, %v520_v22 }
  0x65   : > { %1008 = vmatprep.mubr.bf16.mxu1 %v737_v6  ;;  %v555_v21 = vmul.f32 %v2323_v26, %v479_v12  ;;  %v598_v38 = vadd.f32 %v2325_v27, %v522_v24  ;;  %v554_v39 = vmul.f32 %v2321_v25, %v478_v29  ;;  %v527_v51 = vmul.f32 %v2323_v26, %v451_v44  ;;  %v430_v12 = vld [vmem:[%s2304_s24 + $0xb0] sm:$0xff] }
  0x66   : > { %v723_v32 = vpack.c.bf16 %v663_v20, %v661_v19  ;;  %v693_v37 = vmax.f32 %v629_v23, 0.0  ;;  %v660_v43 = vmax.f32 %v596_v34, 0.0  ;;  %v483_v53 = vunpack.c.h.bf16 %v429_v41 }
  0x67   : > { %1745 = vmatpush3.bf16.msra.mxu0 %v1962_v30  ;;  %1859 = vmatpush3.bf16.msra.mxu1 %v1962_v30  ;;  %v552_v30 = vmul.f32 %v2321_v25, %v476_v17  ;;  %v631_v33 = vadd.f32 %v2327_v28, %v555_v21  ;;  %v662_v46 = vmax.f32 %v598_v38, 0.0  ;;  %v630_v47 = vadd.f32 %v2325_v27, %v554_v39  ;;  %v431_v17 = vld [vmem:[%s2304_s24 + $0xb8] sm:$0xff] }
  0x68   : > { %1746 = vmatprep.subr.bf16.mxu0 %v1963_v35  ;;  %1852 = vmatprep.subr.bf16.mxu1 %v1963_v35  ;;  %v449_v35 = vunpack.c.h.bf16 %v412_v18  ;;  %v448_v57 = vunpack.c.l.bf16 %v412_v18  ;;  %v603_v58 = vadd.f32 %v2327_v28, %v527_v51  ;;  %v559_v60 = vmul.f32 %v2323_v26, %v483_v53  ;;  %v417_v51 = vld [vmem:[%s2304_s24 + $0x48] sm:$0xff] }
  0x69   : > { %v628_v40 = vadd.f32 %v2325_v27, %v552_v30  ;;  %v695_v42 = vmax.f32 %v631_v33, 0.0  ;;  %v694_v55 = vmax.f32 %v630_v47, 0.0  ;;  %v450_v61 = vunpack.c.l.bf16 %v413_v31 }
  0x6a   : > { %v525_v45 = vmul.f32 %v2323_v26, %v449_v35  ;;  %v524_v1 = vmul.f32 %v2321_v25, %v448_v57  ;;  %v480_v2 = vunpack.c.l.bf16 %v428_v36  ;;  %v667_v3 = vmax.f32 %v603_v58, 0.0 }
  0x6b   : > { %1747 = vmatpush3.bf16.msra.mxu0 %v1964_v49  ;;  %1860 = vmatpush3.bf16.msra.mxu1 %v1964_v49  ;;  %v692_v48 = vmax.f32 %v628_v40, 0.0  ;;  %v481_v49 = vunpack.c.h.bf16 %v428_v36  ;;  %v739_v50 = vpack.c.bf16 %v695_v42, %v693_v37  ;;  %v635_v4 = vadd.f32 %v2327_v28, %v559_v60  ;;  %v416_v42 = vld [vmem:[%s2304_s24 + $0x40] sm:$0xff] }
  0x6c   : > { %1748 = vmatprep.subr.bf16.mxu0 %v1965_v54  ;;  %1853 = vmatprep.subr.bf16.mxu1 %v1965_v54  ;;  %v601_v52 = vadd.f32 %v2327_v28, %v525_v45  ;;  %v722_v54 = vpack.c.bf16 %v662_v46, %v660_v43  ;;  %v482_v6 = vunpack.c.l.bf16 %v429_v41  ;;  %v600_v9 = vadd.f32 %v2325_v27, %v524_v1 }
  0x6d   : > { %v557_v56 = vmul.f32 %v2323_v26, %v481_v49  ;;  %v738_v63 = vpack.c.bf16 %v694_v55, %v692_v48  ;;  %v556_v10 = vmul.f32 %v2321_v25, %v480_v2  ;;  %v453_v11 = vunpack.c.h.bf16 %v414_v62 }
  0x6e   : > { %v665_v59 = vmax.f32 %v601_v52, 0.0  ;;  %v558_v16 = vmul.f32 %v2321_v25, %v482_v6  ;;  %v664_v18 = vmax.f32 %v600_v9, 0.0  ;;  %v485_v29 = vunpack.c.h.bf16 %v430_v12 }
  0x6f   : > { %1749 = vmatpush3.bf16.msra.mxu0 %v1966_v5  ;;  %1861 = vmatpush3.bf16.msra.mxu1 %v1966_v5  ;;  %v633_v0 = vadd.f32 %v2327_v28, %v557_v56  ;;  %v526_v5 = vmul.f32 %v2321_v25, %v450_v61  ;;  %v632_v19 = vadd.f32 %v2325_v27, %v556_v10  ;;  %v487_v33 = vunpack.c.h.bf16 %v431_v17  ;;  %v432_v56 = vld [vmem:[%s2304_s24 + $0xc0] sm:$0xff]  ;;  %v433_v61 = vld [vmem:[%s2304_s24 + $0xc8] sm:$0xff] }
  0x70   : > { %v725_v13 = vpack.c.bf16 %v667_v3, %v665_v59  ;;  %v529_v21 = vmul.f32 %v2323_v26, %v453_v11  ;;  %v634_v24 = vadd.f32 %v2325_v27, %v558_v16  ;;  %v561_v36 = vmul.f32 %v2323_v26, %v485_v29 }
  0x71   : > { %v697_v8 = vmax.f32 %v633_v0, 0.0  ;;  %v602_v15 = vadd.f32 %v2325_v27, %v526_v5  ;;  %v696_v30 = vmax.f32 %v632_v19, 0.0  ;;  %v452_v37 = vunpack.c.l.bf16 %v414_v62 }
  0x72   : > { %945 = vmatmul.mubr.bf16.vlgmr.msra.gmra.mxu0 %v720_v7  ;;  %1009 = vmatmul.mubr.bf16.vlgmr.msra.gmra.mxu1 %v736_v14  ;;  %v415_v7 = vld [vmem:[%s2304_s24 + $0x38] sm:$0xff]  ;;  %v699_v14 = vmax.f32 %v635_v4, 0.0  ;;  %v698_v35 = vmax.f32 %v634_v24, 0.0  ;;  %v563_v40 = vmul.f32 %v2323_v26, %v487_v33  ;;  %v637_v44 = vadd.f32 %v2327_v28, %v561_v36  ;;  %v434_v36 = vld [vmem:[%s2304_s24 + $0xd0] sm:$0xff] }
  0x73   : > { %952 = vmatprep.mubr.bf16.mxu0 %v723_v32  ;;  %1016 = vmatprep.mubr.bf16.mxu1 %v739_v50  ;;  %v455_v20 = vunpack.c.h.bf16 %v415_v7  ;;  %v666_v23 = vmax.f32 %v602_v15, 0.0  ;;  %v605_v32 = vadd.f32 %v2327_v28, %v529_v21  ;;  %v454_v41 = vunpack.c.l.bf16 %v415_v7 }
  0x74   : > { %v741_v22 = vpack.c.bf16 %v699_v14, %v697_v8  ;;  %v740_v43 = vpack.c.bf16 %v698_v35, %v696_v30  ;;  %v528_v45 = vmul.f32 %v2321_v25, %v452_v37  ;;  %v484_v46 = vunpack.c.l.bf16 %v430_v12 }
  0x75   : > { %v531_v31 = vmul.f32 %v2323_v26, %v455_v20  ;;  %v724_v34 = vpack.c.bf16 %v666_v23, %v664_v18  ;;  %v669_v39 = vmax.f32 %v605_v32, 0.0  ;;  %v639_v48 = vadd.f32 %v2327_v28, %v563_v40  ;;  %v418_v18 = vld [vmem:[%s2304_s24 + $0x50] sm:$0xff] }
  0x76   : > { %v530_v49 = vmul.f32 %v2321_v25, %v454_v41  ;;  %v486_v50 = vunpack.c.l.bf16 %v431_v17  ;;  %v701_v52 = vmax.f32 %v637_v44, 0.0  ;;  %v604_v53 = vadd.f32 %v2325_v27, %v528_v45  ;;  %v435_v41 = vld [vmem:[%s2304_s24 + $0xd8] sm:$0xff] }
  0x77   : > { %v607_v38 = vadd.f32 %v2327_v28, %v531_v31  ;;  %v457_v55 = vunpack.c.h.bf16 %v416_v42  ;;  %v703_v58 = vmax.f32 %v639_v48, 0.0  ;;  %v459_v0 = vunpack.c.h.bf16 %v417_v51  ;;  %v419_v31 = vld [vmem:[%s2304_s24 + $0x58] sm:$0xff] }
  0x78   : > { %v606_v59 = vadd.f32 %v2325_v27, %v530_v49  ;;  %v562_v60 = vmul.f32 %v2321_v25, %v486_v50  ;;  %v668_v62 = vmax.f32 %v604_v53, 0.0  ;;  %v489_v5 = vunpack.c.h.bf16 %v432_v56 }
  0x79   : > { %v671_v47 = vmax.f32 %v607_v38, 0.0  ;;  %v533_v1 = vmul.f32 %v2323_v26, %v457_v55  ;;  %v743_v2 = vpack.c.bf16 %v703_v58, %v701_v52  ;;  %v535_v7 = vmul.f32 %v2323_v26, %v459_v0 }
  0x7a   : > { %953 = vmatmul.mubr.bf16.gmra.mxu0 %v722_v54  ;;  %1017 = vmatmul.mubr.bf16.gmra.mxu1 %v738_v63  ;;  %v560_v54 = vmul.f32 %v2321_v25, %v484_v46  ;;  %v670_v3 = vmax.f32 %v606_v59, 0.0  ;;  %v638_v4 = vadd.f32 %v2325_v27, %v562_v60  ;;  %v491_v9 = vunpack.c.h.bf16 %v433_v61 }
  0x7b   : > { %960 = vmatprep.mubr.bf16.mxu0 %v725_v13  ;;  %1024 = vmatprep.mubr.bf16.mxu1 %v741_v22  ;;  %v727_v57 = vpack.c.bf16 %v671_v47, %v669_v39  ;;  %v609_v8 = vadd.f32 %v2327_v28, %v533_v1  ;;  %v565_v12 = vmul.f32 %v2323_v26, %v489_v5  ;;  %v456_v13 = vunpack.c.l.bf16 %v416_v42 }
  0x7c   : > { %v636_v63 = vadd.f32 %v2325_v27, %v560_v54  ;;  %v726_v10 = vpack.c.bf16 %v670_v3, %v668_v62  ;;  %v702_v11 = vmax.f32 %v638_v4, 0.0  ;;  %v611_v14 = vadd.f32 %v2327_v28, %v535_v7  ;;  %v420_v62 = vld [vmem:[%s2304_s24 + $0x60] sm:$0xff]  ;;  %v421_v7 = vld [vmem:[%s2304_s24 + $0x68] sm:$0xff] }
  0x7d   : > { %v673_v15 = vmax.f32 %v609_v8, 0.0  ;;  %v567_v16 = vmul.f32 %v2323_v26, %v491_v9  ;;  %v458_v17 = vunpack.c.l.bf16 %v417_v51  ;;  %v641_v20 = vadd.f32 %v2327_v28, %v565_v12  ;;  %v436_v12 = vld [vmem:[%s2304_s24 + $0xe0] sm:$0xff] }
  0x7e   : > { %v700_v6 = vmax.f32 %v636_v63, 0.0  ;;  %v532_v21 = vmul.f32 %v2321_v25, %v456_v13  ;;  %v488_v22 = vunpack.c.l.bf16 %v432_v56  ;;  %v675_v23 = vmax.f32 %v611_v14, 0.0 }
  0x7f   : > { %v643_v24 = vadd.f32 %v2327_v28, %v567_v16  ;;  %v534_v29 = vmul.f32 %v2321_v25, %v458_v17  ;;  %v490_v30 = vunpack.c.l.bf16 %v433_v61  ;;  %v705_v32 = vmax.f32 %v641_v20, 0.0  ;;  %v437_v17 = vld [vmem:[%s2304_s24 + $0xe8] sm:$0xff] }
  0x80   : > { %v742_v19 = vpack.c.bf16 %v702_v11, %v700_v6  ;;  %v608_v33 = vadd.f32 %v2325_v27, %v532_v21  ;;  %v461_v35 = vunpack.c.h.bf16 %v418_v18  ;;  %v729_v37 = vpack.c.bf16 %v675_v23, %v673_v15 }
  0x81   : > { %v707_v38 = vmax.f32 %v643_v24, 0.0  ;;  %v610_v39 = vadd.f32 %v2325_v27, %v534_v29  ;;  %v566_v40 = vmul.f32 %v2321_v25, %v490_v30  ;;  %v463_v44 = vunpack.c.h.bf16 %v419_v31 }
  0x82   : > { %961 = vmatmul.mubr.bf16.gmra.mxu0 %v724_v34  ;;  %1025 = vmatmul.mubr.bf16.gmra.mxu1 %v740_v43  ;;  %v564_v34 = vmul.f32 %v2321_v25, %v488_v22  ;;  %v672_v42 = vmax.f32 %v608_v33, 0.0  ;;  %v537_v45 = vmul.f32 %v2323_v26, %v461_v35  ;;  %v493_v49 = vunpack.c.h.bf16 %v434_v36 }
  0x83   : > { %968 = vmatprep.mubr.bf16.mxu0 %v727_v57  ;;  %1032 = vmatprep.mubr.bf16.mxu1 %v743_v2  ;;  %v745_v46 = vpack.c.bf16 %v707_v38, %v705_v32  ;;  %v674_v47 = vmax.f32 %v610_v39, 0.0  ;;  %v642_v48 = vadd.f32 %v2325_v27, %v566_v40  ;;  %v539_v51 = vmul.f32 %v2323_v26, %v463_v44 }
  0x84   : > { %v640_v43 = vadd.f32 %v2325_v27, %v564_v34  ;;  %v613_v52 = vadd.f32 %v2327_v28, %v537_v45  ;;  %v495_v53 = vunpack.c.h.bf16 %v435_v41  ;;  %v569_v56 = vmul.f32 %v2323_v26, %v493_v49 }
  0x85   : > { %v728_v54 = vpack.c.bf16 %v674_v47, %v672_v42  ;;  %v706_v55 = vmax.f32 %v642_v48, 0.0  ;;  %v460_v57 = vunpack.c.l.bf16 %v418_v18  ;;  %v615_v58 = vadd.f32 %v2327_v28, %v539_v51  ;;  %v422_v42 = vld [vmem:[%s2304_s24 + $0x70] sm:$0xff]  ;;  %v423_v51 = vld [vmem:[%s2304_s24 + $0x78] sm:$0xff] }
  0x86   : > { %v704_v50 = vmax.f32 %v640_v43, 0.0  ;;  %v677_v59 = vmax.f32 %v613_v52, 0.0  ;;  %v571_v60 = vmul.f32 %v2323_v26, %v495_v53  ;;  %v462_v61 = vunpack.c.l.bf16 %v419_v31 }
  0x87   : > { %v645_v0 = vadd.f32 %v2327_v28, %v569_v56  ;;  %v536_v1 = vmul.f32 %v2321_v25, %v460_v57  ;;  %v492_v2 = vunpack.c.l.bf16 %v434_v36  ;;  %v679_v3 = vmax.f32 %v615_v58, 0.0  ;;  %v438_v56 = vld [vmem:[%s2304_s24 + $0xf0] sm:$0xff] }
  0x88   : > { %v744_v63 = vpack.c.bf16 %v706_v55, %v704_v50  ;;  %v647_v4 = vadd.f32 %v2327_v28, %v571_v60  ;;  %v538_v5 = vmul.f32 %v2321_v25, %v462_v61  ;;  %v494_v6 = vunpack.c.l.bf16 %v435_v41  ;;  %v439_v61 = vld [vmem:[%s2304_s24 + $0xf8] sm:$0xff] }
  0x89   : > { %v709_v8 = vmax.f32 %v645_v0, 0.0  ;;  %v612_v9 = vadd.f32 %v2325_v27, %v536_v1  ;;  %v465_v11 = vunpack.c.h.bf16 %v420_v62  ;;  %v731_v13 = vpack.c.bf16 %v679_v3, %v677_v59 }
  0x8a   : > { %969 = vmatmul.mubr.bf16.gmra.mxu0 %v726_v10  ;;  %1033 = vmatmul.mubr.bf16.gmra.mxu1 %v742_v19  ;;  %v568_v10 = vmul.f32 %v2321_v25, %v492_v2  ;;  %v711_v14 = vmax.f32 %v647_v4, 0.0  ;;  %v614_v15 = vadd.f32 %v2325_v27, %v538_v5  ;;  %v570_v16 = vmul.f32 %v2321_v25, %v494_v6 }
  0x8b   : > { %976 = vmatprep.mubr.bf16.mxu0 %v729_v37  ;;  %1040 = vmatprep.mubr.bf16.mxu1 %v745_v46  ;;  %v676_v18 = vmax.f32 %v612_v9, 0.0  ;;  %v467_v20 = vunpack.c.h.bf16 %v421_v7  ;;  %v541_v21 = vmul.f32 %v2323_v26, %v465_v11  ;;  %v497_v29 = vunpack.c.h.bf16 %v436_v12 }
  0x8c   : > { %v644_v19 = vadd.f32 %v2325_v27, %v568_v10  ;;  %v747_v22 = vpack.c.bf16 %v711_v14, %v709_v8  ;;  %v678_v23 = vmax.f32 %v614_v15, 0.0  ;;  %v646_v24 = vadd.f32 %v2325_v27, %v570_v16 }
  0x8d   : > { %v543_v31 = vmul.f32 %v2323_v26, %v467_v20  ;;  %v617_v32 = vadd.f32 %v2327_v28, %v541_v21  ;;  %v499_v33 = vunpack.c.h.bf16 %v437_v17  ;;  %v573_v36 = vmul.f32 %v2323_v26, %v497_v29 }
  0x8e   : > { %v708_v30 = vmax.f32 %v644_v19, 0.0  ;;  %v730_v34 = vpack.c.bf16 %v678_v23, %v676_v18  ;;  %v710_v35 = vmax.f32 %v646_v24, 0.0  ;;  %v464_v37 = vunpack.c.l.bf16 %v420_v62 }
  0x8f   : > { %v619_v38 = vadd.f32 %v2327_v28, %v543_v31  ;;  %v681_v39 = vmax.f32 %v617_v32, 0.0  ;;  %v575_v40 = vmul.f32 %v2323_v26, %v499_v33  ;;  %v466_v41 = vunpack.c.l.bf16 %v421_v7 }
  0x90   : > { %v746_v43 = vpack.c.bf16 %v710_v35, %v708_v30  ;;  %v649_v44 = vadd.f32 %v2327_v28, %v573_v36  ;;  %v540_v45 = vmul.f32 %v2321_v25, %v464_v37  ;;  %v496_v46 = vunpack.c.l.bf16 %v436_v12 }
  0x91   : > { %v683_v47 = vmax.f32 %v619_v38, 0.0  ;;  %v651_v48 = vadd.f32 %v2327_v28, %v575_v40  ;;  %v542_v49 = vmul.f32 %v2321_v25, %v466_v41  ;;  %v498_v50 = vunpack.c.l.bf16 %v437_v17 }
  0x92   : > { %977 = vmatmul.mubr.bf16.gmra.mxu0 %v728_v54  ;;  %1041 = vmatmul.mubr.bf16.gmra.mxu1 %v744_v63  ;;  %v713_v52 = vmax.f32 %v649_v44, 0.0  ;;  %v616_v53 = vadd.f32 %v2325_v27, %v540_v45  ;;  %v572_v54 = vmul.f32 %v2321_v25, %v496_v46  ;;  %v469_v55 = vunpack.c.h.bf16 %v422_v42 }
  0x93   : > { %984 = vmatprep.mubr.bf16.mxu0 %v731_v13  ;;  %1048 = vmatprep.mubr.bf16.mxu1 %v747_v22  ;;  %v733_v57 = vpack.c.bf16 %v683_v47, %v681_v39  ;;  %v715_v58 = vmax.f32 %v651_v48, 0.0  ;;  %v618_v59 = vadd.f32 %v2325_v27, %v542_v49  ;;  %v574_v60 = vmul.f32 %v2321_v25, %v498_v50 }
  0x94   : > { %v680_v62 = vmax.f32 %v616_v53, 0.0  ;;  %v648_v63 = vadd.f32 %v2325_v27, %v572_v54  ;;  %v471_v0 = vunpack.c.h.bf16 %v423_v51  ;;  %v545_v1 = vmul.f32 %v2323_v26, %v469_v55 }
  0x95   : > { %v749_v2 = vpack.c.bf16 %v715_v58, %v713_v52  ;;  %v682_v3 = vmax.f32 %v618_v59, 0.0  ;;  %v650_v4 = vadd.f32 %v2325_v27, %v574_v60  ;;  %v501_v5 = vunpack.c.h.bf16 %v438_v56 }
  0x96   : > { %v712_v6 = vmax.f32 %v648_v63, 0.0  ;;  %v547_v7 = vmul.f32 %v2323_v26, %v471_v0  ;;  %v621_v8 = vadd.f32 %v2327_v28, %v545_v1  ;;  %v503_v9 = vunpack.c.h.bf16 %v439_v61 }
  0x97   : > { %v732_v10 = vpack.c.bf16 %v682_v3, %v680_v62  ;;  %v714_v11 = vmax.f32 %v650_v4, 0.0  ;;  %v577_v12 = vmul.f32 %v2323_v26, %v501_v5  ;;  %v468_v13 = vunpack.c.l.bf16 %v422_v42 }
  0x98   : > { %v623_v14 = vadd.f32 %v2327_v28, %v547_v7  ;;  %v685_v15 = vmax.f32 %v621_v8, 0.0  ;;  %v579_v16 = vmul.f32 %v2323_v26, %v503_v9  ;;  %v470_v17 = vunpack.c.l.bf16 %v423_v51 }
  0x99   : > { %v748_v18 = vpack.c.bf16 %v714_v11, %v712_v6  ;;  %v653_v19 = vadd.f32 %v2327_v28, %v577_v12  ;;  %v544_v20 = vmul.f32 %v2321_v25, %v468_v13  ;;  %v500_v21 = vunpack.c.l.bf16 %v438_v56 }
  0x9a   : > { %985 = vmatmul.mubr.bf16.gmra.mxu0 %v730_v34  ;;  %1049 = vmatmul.mubr.bf16.gmra.mxu1 %v746_v43  ;;  %v687_v22 = vmax.f32 %v623_v14, 0.0  ;;  %v655_v23 = vadd.f32 %v2327_v28, %v579_v16  ;;  %v546_v24 = vmul.f32 %v2321_v25, %v470_v17  ;;  %v502_v29 = vunpack.c.l.bf16 %v439_v61 }
  0x9b   : > { %992 = vmatprep.mubr.bf16.mxu0 %v733_v57  ;;  %1056 = vmatprep.mubr.bf16.mxu1 %v749_v2  ;;  %v717_v30 = vmax.f32 %v653_v19, 0.0  ;;  %v620_v31 = vadd.f32 %v2325_v27, %v544_v20  ;;  %v576_v26 = vmul.f32 %v2321_v25, %v500_v21 }
  0x9c   : > { %v735_v32 = vpack.c.bf16 %v687_v22, %v685_v15  ;;  %v719_v33 = vmax.f32 %v655_v23, 0.0  ;;  %v622_v34 = vadd.f32 %v2325_v27, %v546_v24  ;;  %v578_v35 = vmul.f32 %v2321_v25, %v502_v29 }
  0x9d   : > { %v684_v36 = vmax.f32 %v620_v31, 0.0  ;;  %v652_v37 = vadd.f32 %v2325_v27, %v576_v26 }
  0x9e   : > { %v751_v28 = vpack.c.bf16 %v719_v33, %v717_v30  ;;  %v686_v38 = vmax.f32 %v622_v34, 0.0  ;;  %v654_v39 = vadd.f32 %v2325_v27, %v578_v35  ;;  %v2492_v27 = vld [vmem:[%s2603_s4] ss:$0 sm:$0xff] }
  0x9f   : > { %v716_v40 = vmax.f32 %v652_v37, 0.0 }
  0xa0   : > { %v734_v41 = vpack.c.bf16 %v686_v38, %v684_v36  ;;  %v718_v42 = vmax.f32 %v654_v39, 0.0 }
  0xa2   : > { %993 = vmatmul.mubr.bf16.gmra.mxu0 %v732_v10  ;;  %1057 = vmatmul.mubr.bf16.gmra.mxu1 %v748_v18  ;;  %v750_v43 = vpack.c.bf16 %v718_v42, %v716_v40 }
  0xa3   : > { %1000 = vmatprep.mubr.bf16.mxu0 %v735_v32  ;;  %1064 = vmatprep.mubr.bf16.mxu1 %v751_v28 }
  0xaa   : > { %1001 = vmatmul.mubr.bf16.gmra.mxu0 %v734_v41  ;;  %1065 = vmatmul.mubr.bf16.gmra.mxu1 %v750_v43 }
 0x132   : > { %v1750_v44 = vpop.f32.mrf.mxu0  ;;  %v1798_v45 = vpop.f32.mrf.mxu1 }
 0x134   : > { %v1751_v46 = vpop.f32.mrf.mxu0  ;;  %v1799_v25 = vpop.f32.mrf.mxu1 }
 0x135   : > { %v1752_v49 = vadd.f32 %v1751_v46, %v1750_v44  ;;  %v1800_v50 = vadd.f32 %v1799_v25, %v1798_v45 }
 0x136   : > { %v1753_v47 = vpop.f32.mrf.mxu0  ;;  %v1801_v48 = vpop.f32.mrf.mxu1 }
 0x137   : > { %v1179_v57 = vadd.f32 %v1752_v49, %v2492_v27  ;;  %v1195_v58 = vadd.f32 %v1800_v50, %v2492_v27 }
 0x138   : > { %v1754_v51 = vpop.f32.mrf.mxu0  ;;  %v1802_v52 = vpop.f32.mrf.mxu1 }
 0x139   : > { %v1755_v53 = vadd.f32 %v1754_v51, %v1753_v47  ;;  %v1803_v54 = vadd.f32 %v1802_v52, %v1801_v48 }
 0x13a   : > { %v1756_v55 = vpop.f32.mrf.mxu0  ;;  %v1804_v56 = vpop.f32.mrf.mxu1 }
 0x13b   : > { %v1180_v59 = vadd.f32 %v1755_v53, %v2492_v27  ;;  %v1196_v60 = vadd.f32 %v1803_v54, %v2492_v27 }
 0x13c   : > { %v1757_v61 = vpop.f32.mrf.mxu0  ;;  %v1805_v62 = vpop.f32.mrf.mxu1 }
 0x13d   : > { %v1642_v63 = vpack.c.bf16 %v1180_v59, %v1179_v57  ;;  %v1682_v0 = vpack.c.bf16 %v1196_v60, %v1195_v58  ;;  %v1758_v3 = vadd.f32 %v1757_v61, %v1756_v55  ;;  %v1806_v4 = vadd.f32 %v1805_v62, %v1804_v56 }
 0x13e   : > { %v1759_v1 = vpop.f32.mrf.mxu0  ;;  %v1807_v2 = vpop.f32.mrf.mxu1 }
 0x13f   : > { %1643 = vst [vmem:[%s2499_s10] sm:$0xff] %v1642_v63   ;;  %1726 = vst [vmem:[%s2499_s10 + $0x40] sm:$0xff] %v1682_v0   ;;  %v1181_v11 = vadd.f32 %v1758_v3, %v2492_v27  ;;  %v1197_v12 = vadd.f32 %v1806_v4, %v2492_v27 }
 0x140   : > { %v1760_v5 = vpop.f32.mrf.mxu0  ;;  %v1808_v6 = vpop.f32.mrf.mxu1 }
 0x141   : > { %v1761_v7 = vadd.f32 %v1760_v5, %v1759_v1  ;;  %v1809_v8 = vadd.f32 %v1808_v6, %v1807_v2 }
 0x142   : > { %v1762_v9 = vpop.f32.mrf.mxu0  ;;  %v1810_v10 = vpop.f32.mrf.mxu1 }
 0x143   : > { %v1182_v13 = vadd.f32 %v1761_v7, %v2492_v27  ;;  %v1198_v14 = vadd.f32 %v1809_v8, %v2492_v27 }
 0x144   : > { %v1763_v15 = vpop.f32.mrf.mxu0  ;;  %v1811_v16 = vpop.f32.mrf.mxu1 }
 0x145   : > { %v1647_v17 = vpack.c.bf16 %v1182_v13, %v1181_v11  ;;  %v1687_v18 = vpack.c.bf16 %v1198_v14, %v1197_v12  ;;  %v1764_v21 = vadd.f32 %v1763_v15, %v1762_v9  ;;  %v1812_v22 = vadd.f32 %v1811_v16, %v1810_v10 }
 0x146   : > { %v1765_v19 = vpop.f32.mrf.mxu0  ;;  %v1813_v20 = vpop.f32.mrf.mxu1 }
 0x147   : > { %1719 = vst [vmem:[%s2499_s10 + $0x8] sm:$0xff] %v1647_v17   ;;  %1727 = vst [vmem:[%s2499_s10 + $0x48] sm:$0xff] %v1687_v18   ;;  %v1183_v26 = vadd.f32 %v1764_v21, %v2492_v27  ;;  %v1199_v32 = vadd.f32 %v1812_v22, %v2492_v27 }
 0x148   : > { %v1766_v23 = vpop.f32.mrf.mxu0  ;;  %v1814_v24 = vpop.f32.mrf.mxu1 }
 0x149   : > { %v1767_v29 = vadd.f32 %v1766_v23, %v1765_v19  ;;  %v1815_v30 = vadd.f32 %v1814_v24, %v1813_v20 }
 0x14a   : > { %v1768_v31 = vpop.f32.mrf.mxu0  ;;  %v1816_v35 = vpop.f32.mrf.mxu1 }
 0x14b   : > { %v1184_v33 = vadd.f32 %v1767_v29, %v2492_v27  ;;  %v1200_v34 = vadd.f32 %v1815_v30, %v2492_v27 }
 0x14c   : > { %v1769_v36 = vpop.f32.mrf.mxu0  ;;  %v1817_v38 = vpop.f32.mrf.mxu1 }
 0x14d   : > { %v1652_v37 = vpack.c.bf16 %v1184_v33, %v1183_v26  ;;  %v1692_v28 = vpack.c.bf16 %v1200_v34, %v1199_v32  ;;  %v1770_v40 = vadd.f32 %v1769_v36, %v1768_v31  ;;  %v1818_v42 = vadd.f32 %v1817_v38, %v1816_v35 }
 0x14e   : > { %v1771_v39 = vpop.f32.mrf.mxu0  ;;  %v1819_v41 = vpop.f32.mrf.mxu1 }
 0x14f   : > { %1720 = vst [vmem:[%s2499_s10 + $0x10] sm:$0xff] %v1652_v37   ;;  %1728 = vst [vmem:[%s2499_s10 + $0x50] sm:$0xff] %v1692_v28   ;;  %v1185_v47 = vadd.f32 %v1770_v40, %v2492_v27  ;;  %v1201_v49 = vadd.f32 %v1818_v42, %v2492_v27 }
 0x150   : > { %v1772_v43 = vpop.f32.mrf.mxu0  ;;  %v1820_v45 = vpop.f32.mrf.mxu1 }
 0x151   : > { %v1773_v44 = vadd.f32 %v1772_v43, %v1771_v39  ;;  %v1821_v46 = vadd.f32 %v1820_v45, %v1819_v41 }
 0x152   : > { %v1774_v25 = vpop.f32.mrf.mxu0  ;;  %v1822_v51 = vpop.f32.mrf.mxu1 }
 0x153   : > { %v1186_v48 = vadd.f32 %v1773_v44, %v2492_v27  ;;  %v1202_v50 = vadd.f32 %v1821_v46, %v2492_v27 }
 0x154   : > { %v1775_v52 = vpop.f32.mrf.mxu0  ;;  %v1823_v55 = vpop.f32.mrf.mxu1 }
 0x155   : > { %v1657_v53 = vpack.c.bf16 %v1186_v48, %v1185_v47  ;;  %v1697_v54 = vpack.c.bf16 %v1202_v50, %v1201_v49  ;;  %v1776_v57 = vadd.f32 %v1775_v52, %v1774_v25  ;;  %v1824_v60 = vadd.f32 %v1823_v55, %v1822_v51 }
 0x156   : > { %v1777_v56 = vpop.f32.mrf.mxu0  ;;  %v1825_v58 = vpop.f32.mrf.mxu1 }
 0x157   : > { %1721 = vst [vmem:[%s2499_s10 + $0x18] sm:$0xff] %v1657_v53   ;;  %1729 = vst [vmem:[%s2499_s10 + $0x58] sm:$0xff] %v1697_v54   ;;  %v1187_v63 = vadd.f32 %v1776_v57, %v2492_v27  ;;  %v1203_v3 = vadd.f32 %v1824_v60, %v2492_v27 }
 0x158   : > { %v1778_v59 = vpop.f32.mrf.mxu0  ;;  %v1826_v62 = vpop.f32.mrf.mxu1 }
 0x159   : > { %v1779_v61 = vadd.f32 %v1778_v59, %v1777_v56  ;;  %v1827_v1 = vadd.f32 %v1826_v62, %v1825_v58 }
 0x15a   : > { %v1780_v2 = vpop.f32.mrf.mxu0  ;;  %v1828_v6 = vpop.f32.mrf.mxu1 }
 0x15b   : > { %v1188_v0 = vadd.f32 %v1779_v61, %v2492_v27  ;;  %v1204_v5 = vadd.f32 %v1827_v1, %v2492_v27 }
 0x15c   : > { %v1781_v7 = vpop.f32.mrf.mxu0  ;;  %v1829_v9 = vpop.f32.mrf.mxu1 }
 0x15d   : > { %v1662_v4 = vpack.c.bf16 %v1188_v0, %v1187_v63  ;;  %v1702_v8 = vpack.c.bf16 %v1204_v5, %v1203_v3  ;;  %v1782_v11 = vadd.f32 %v1781_v7, %v1780_v2  ;;  %v1830_v14 = vadd.f32 %v1829_v9, %v1828_v6 }
 0x15e   : > { %v1783_v10 = vpop.f32.mrf.mxu0  ;;  %v1831_v12 = vpop.f32.mrf.mxu1 }
 0x15f   : > { %1722 = vst [vmem:[%s2499_s10 + $0x20] sm:$0xff] %v1662_v4   ;;  %1730 = vst [vmem:[%s2499_s10 + $0x60] sm:$0xff] %v1702_v8   ;;  %v1189_v17 = vadd.f32 %v1782_v11, %v2492_v27  ;;  %v1205_v21 = vadd.f32 %v1830_v14, %v2492_v27 }
 0x160   : > { %v1784_v13 = vpop.f32.mrf.mxu0  ;;  %v1832_v16 = vpop.f32.mrf.mxu1 }
 0x161   : > { %v1785_v15 = vadd.f32 %v1784_v13, %v1783_v10  ;;  %v1833_v19 = vadd.f32 %v1832_v16, %v1831_v12 }
 0x162   : > { %v1786_v20 = vpop.f32.mrf.mxu0  ;;  %v1834_v24 = vpop.f32.mrf.mxu1 }
 0x163   : > { %v1190_v18 = vadd.f32 %v1785_v15, %v2492_v27  ;;  %v1206_v23 = vadd.f32 %v1833_v19, %v2492_v27 }
 0x164   : > { %v1787_v29 = vpop.f32.mrf.mxu0  ;;  %v1835_v31 = vpop.f32.mrf.mxu1 }
 0x165   : > { %v1667_v22 = vpack.c.bf16 %v1190_v18, %v1189_v17  ;;  %v1707_v30 = vpack.c.bf16 %v1206_v23, %v1205_v21  ;;  %v1788_v32 = vadd.f32 %v1787_v29, %v1786_v20  ;;  %v1836_v35 = vadd.f32 %v1835_v31, %v1834_v24 }
 0x166   : > { %v1789_v26 = vpop.f32.mrf.mxu0  ;;  %v1837_v33 = vpop.f32.mrf.mxu1 }
 0x167   : > { %1723 = vst [vmem:[%s2499_s10 + $0x28] sm:$0xff] %v1667_v22   ;;  %1731 = vst [vmem:[%s2499_s10 + $0x68] sm:$0xff] %v1707_v30   ;;  %v1191_v28 = vadd.f32 %v1788_v32, %v2492_v27  ;;  %v1207_v41 = vadd.f32 %v1836_v35, %v2492_v27 }
 0x168   : > { %v1790_v34 = vpop.f32.mrf.mxu0  ;;  %v1838_v37 = vpop.f32.mrf.mxu1 }
 0x169   : > { %v1791_v36 = vadd.f32 %v1790_v34, %v1789_v26  ;;  %v1839_v39 = vadd.f32 %v1838_v37, %v1837_v33 }
 0x16a   : > { %v1792_v40 = vpop.f32.mrf.mxu0  ;;  %v1840_v44 = vpop.f32.mrf.mxu1 }
 0x16b   : > { %v1192_v38 = vadd.f32 %v1791_v36, %v2492_v27  ;;  %v1208_v43 = vadd.f32 %v1839_v39, %v2492_v27 }
 0x16c   : > { %v1793_v45 = vpop.f32.mrf.mxu0  ;;  %v1841_v25 = vpop.f32.mrf.mxu1 }
 0x16d   : > { %v1672_v42 = vpack.c.bf16 %v1192_v38, %v1191_v28  ;;  %v1712_v46 = vpack.c.bf16 %v1208_v43, %v1207_v41  ;;  %v1794_v48 = vadd.f32 %v1793_v45, %v1792_v40  ;;  %v1842_v51 = vadd.f32 %v1841_v25, %v1840_v44 }
 0x16e   : > { %v1795_v47 = vpop.f32.mrf.mxu0  ;;  %v1843_v49 = vpop.f32.mrf.mxu1 }
 0x16f   : > { %1724 = vst [vmem:[%s2499_s10 + $0x30] sm:$0xff] %v1672_v42   ;;  %1732 = vst [vmem:[%s2499_s10 + $0x70] sm:$0xff] %v1712_v46   ;;  %v1193_v54 = vadd.f32 %v1794_v48, %v2492_v27  ;;  %v1209_v57 = vadd.f32 %v1842_v51, %v2492_v27 }
 0x170   : > { %v1796_v50 = vpop.f32.mrf.mxu0  ;;  %v1844_v53 = vpop.f32.mrf.mxu1 }
 0x171   : > { %v1797_v52 = vadd.f32 %v1796_v50, %v1795_v47  ;;  %v1845_v56 = vadd.f32 %v1844_v53, %v1843_v49 }
 0x173   : > { %v1194_v55 = vadd.f32 %v1797_v52, %v2492_v27  ;;  %v1210_v59 = vadd.f32 %v1845_v56, %v2492_v27 }
 0x175   : > { %v1677_v58 = vpack.c.bf16 %v1194_v55, %v1193_v54  ;;  %v1717_v60 = vpack.c.bf16 %v1210_v59, %v1209_v57 }
 0x177   : > { %1725 = vst [vmem:[%s2499_s10 + $0x38] sm:$0xff] %v1677_v58   ;;  %1733 = vst [vmem:[%s2499_s10 + $0x78] sm:$0xff] %v1717_v60  }
 0x178   : > { %2060 = shalt.err (!%p2057_p4)
}
 0x179   : > { %s2061_s13 = scalar_lea.hbm %s2548_s8, 2048  ;;  %s2065_s27 = scalar_lea.hbm %s2604_s5, 16384 }
 0x17a   : > { %p2062_p10 = scmp.ne.s32.totalorder %s2548_s8, %s2061_s13  ;;  %p2066_p0 = scmp.lt.s32.totalorder %s2548_s8, %s2604_s5 }
 0x17b   : > { %p2067_p6 = scmp.lt.s32.totalorder %s2065_s27, %s2061_s13 }
 0x17c   : > { %p2063_p11 = pnand %p2062_p10, %p2631_p7 }
 0x17d   : > { %p2068_p5 = por %p2067_p6, %p2066_p0 }
 0x17e   : > { %p2064_p13 = pneg %p2063_p11 }
 0x180   : > { %p2069_p3 = pnand %p2068_p5, %p2064_p13 }
 0x182   : > { %2072 = shalt.err (!%p2069_p3)
}
 0x183   : > { %s2141_s7 = smov 64   ;;  %s2142_s10 = smov 4  }
 0x184   : > { %1872 = dma.vmem_to_hbm [thread:$0]  (%p2631_p7), %s2550_s12, 2048, %s2548_s8, %s1372_s21, %s2141_s7, %s2141_s7, %s2142_s10  }
 0x185 PF: > { %s2632_s17 = sld [smem:[#allocation13_spill]]  ;;  %p1894_p8 = scmp.ge.s32.totalorder %s2131_s23, 2 }
 0x186   : > { %s2633_s25 = sld [smem:[#allocation14_spill]] }
 0x18b   : > { %s1401_s28 = sand.u32 1, %s2632_s17  }
 0x18c   : > { %p2634_p9 = scmp.ne.s32.totalorder %s2633_s25, 0  ;;  %s1402_s1 = scalar_lea.sflag [#allocation5], %s1401_s28 }
 0x18e   : > { %p1886_p12 = pnand %p1894_p8, %p2634_p9 }
 0x190   : > { %p1887_p1 = pneg %p1886_p12 }
 0x192   : > { %2106 = dma.done.wait (%p1887_p1), %s1402_s1, 2048  }
 0x193   : > { %2108 = vsyncadd (%p1887_p1), %s1402_s1, 4294965248  ;;  %s22_s23 = sadd.s32 1, %s2131_s23   ;;  %s2635_s18 = smov %s2115_s19 }
 0x194   : > { %p19_p2 = scmp.ge.s32.totalorder %s22_s23, 10   ;;  %s2636_s19 = smov %s2119_s20 }
 0x195   : > { %s2637_s20 = smov %s2295_s14  ;;  %s2638_s21 = smov %s2127_s22 }
 0x196   : > { %s2639_s22 = smov %s2641_s11  ;;  %21 = sbr.rel (!%p19_p2) target bundleno = 9 (0x9), region = 109 }
 0x19b   :  { %1407 = vsyncpa [#allocation4], 1 }
 0x19c   :  { %1409 = vsyncpa [#allocation4 + $0x1], 1 }
 0x19d   :  { %1410 = vsyncpa [#allocation7], 1 }
 0x19e   :  { %1411 = vsyncpa [#allocation5], 1 }
 0x19f   :  { %1413 = vsyncpa [#allocation5 + $0x1], 1 }

</bundles_post_ra>
